<compile_context>
chip_gen: v5e
topology: v5e:2x2
jax: 0.10.0
libtpu: 0.0.40
codegen_flags: <defaults>
</compile_context>

<pallas_src>
import jax
import jax.numpy as jnp
from jax import lax
from jax.experimental import pallas as pl
from jax.experimental.pallas import tpu as pltpu

HIDDEN = 64


def _elu(x):
    # ELU(alpha=1): x if x > 0 else exp(x) - 1.  min() keeps the inactive
    # branch finite (no inf/NaN even for large positive pre-activations).
    return jnp.where(x > 0, x, jnp.exp(jnp.minimum(x, 0.0)) - 1.0)


def rnd_target_kernel(x_ref, w1_ref, b1_ref, w2_ref, b2_ref, w3_ref, b3_ref,
                      o_ref):
    # x_ref: (TB, S) in natural batch-major layout straight from HBM.
    # Matmuls run on the MXU in bf16 with f32 accumulation; contracting over S
    # of both operands puts the batch axis on lanes for all intermediates.
    x = x_ref[...].astype(jnp.bfloat16)                 # (TB, S)
    w1 = w1_ref[...].astype(jnp.bfloat16)               # (64, S)

    # h1 = w1 @ x^T -> (64, TB); in-kernel transpose handled by Mosaic (XLU).
    h1 = lax.dot_general(w1, x, (((1,), (1,)), ((), ())),
                         preferred_element_type=jnp.float32)
    h1 = _elu(h1 + b1_ref[...])                          # (64, TB) f32

    w2 = w2_ref[...].astype(jnp.bfloat16)                # (64, 64)
    h2 = lax.dot_general(w2, h1.astype(jnp.bfloat16),
                         (((1,), (0,)), ((), ())),
                         preferred_element_type=jnp.float32)
    h2 = _elu(h2 + b2_ref[...])                          # (64, TB) f32

    # Final 64 -> 1 layer: VPU multiply + sublane reduction (avoids a
    # degenerate M=1 MXU matmul), then the scalar bias from SMEM.
    out = jnp.sum(h2 * w3_ref[...], axis=0, keepdims=True)   # (1, TB)
    o_ref[...] = out + b3_ref[0, 0]


def _round_up(x, m):
    return ((x + m - 1) // m) * m


def _choose_tile(batch, block_b):
    """Lane-dense batch tile: large enough to amortize per-step overhead,
    floored at 512, and capped so large batches keep >= 2 grid steps (so the
    'parallel' grid axis can shard across both v7x TensorCores)."""
    block_b = max(512, _round_up(block_b, 128))
    b128 = _round_up(batch, 128)
    if b128 <= block_b:
        return b128                       # small batch: one tile, one step
    half = _round_up(pl.cdiv(b128, 2), 128)
    return max(512, min(block_b, half))


def rnd_target_forward(state, params, block_b=4096):
    """state: (B, state_dim) f32.

    params (PyTorch-native orientation):
      w1: (64, state_dim)  b1: (64, 1)
      w2: (64, 64)         b2: (64, 1)
      w3: (64, 1)  (column of PyTorch's (1, 64) weight)   b3: (1, 1)
    Returns (B, 1) f32.
    """
    B, state_dim = state.shape
    w1, b1 = params["w1"], params["b1"]
    w2, b2 = params["w2"], params["b2"]
    w3, b3 = params["w3"], params["b3"]

    TB = _choose_tile(B, block_b)
    B_pad = _round_up(B, TB)

    x = state.astype(jnp.float32)
    if B_pad != B:
        x = jnp.pad(x, ((0, B_pad - B), (0, 0)))   # padded rows sliced off below

    grid = (B_pad // TB,)
    out_t = pl.pallas_call(
        rnd_target_kernel,
        out_shape=jax.ShapeDtypeStruct((1, B_pad), jnp.float32),
        grid=grid,
        in_specs=[
            pl.BlockSpec((TB, state_dim), lambda i: (i, 0)),      # x (streamed)
            pl.BlockSpec((HIDDEN, state_dim), lambda i: (0, 0)),  # w1 (resident)
            pl.BlockSpec((HIDDEN, 1), lambda i: (0, 0)),          # b1
            pl.BlockSpec((HIDDEN, HIDDEN), lambda i: (0, 0)),     # w2
            pl.BlockSpec((HIDDEN, 1), lambda i: (0, 0)),          # b2
            pl.BlockSpec((HIDDEN, 1), lambda i: (0, 0)),          # w3 column
            pl.BlockSpec(memory_space=pltpu.MemorySpace.SMEM),    # b3 scalar
        ],
        out_specs=pl.BlockSpec((1, TB), lambda i: (0, i)),
        compiler_params=pltpu.CompilerParams(
            dimension_semantics=("parallel",),
            vmem_limit_bytes=32 * 1024 * 1024,   # TB=4096 uses well under 8 MiB
        ),
    )(x, w1, b1, w2, b2, w3, b3)

    # Slice off batch padding and restore (B, 1).
    return out_t[0, :B][:, None]


def init_params(state_dim, key):
    """Deterministic synthetic init (PyTorch-Linear-like uniform fan-in),
    stored in the kernel's (out, in) / column-bias orientation."""
    ks = jax.random.split(key, 6)

    def linear(kw, kb, fan_in, fan_out):
        bound = 1.0 / jnp.sqrt(fan_in)
        w = jax.random.uniform(kw, (fan_out, fan_in), jnp.float32,
                               -bound, bound)
        b = jax.random.uniform(kb, (fan_out, 1), jnp.float32, -bound, bound)
        return w, b

    w1, b1 = linear(ks[0], ks[1], state_dim, HIDDEN)
    w2, b2 = linear(ks[2], ks[3], HIDDEN, HIDDEN)
    w3_row, b3 = linear(ks[4], ks[5], HIDDEN, 1)
    return {"w1": w1, "b1": b1, "w2": w2, "b2": b2,
            "w3": w3_row.T,            # (64, 1) column
            "b3": b3}                  # (1, 1)


def reference_forward(state, p):
    h1 = _elu(state @ p["w1"].T + p["b1"].T)
    h2 = _elu(h1 @ p["w2"].T + p["b2"].T)
    return h2 @ p["w3"] + p["b3"]


if __name__ == "__main__":
    key = jax.random.PRNGKey(0)
    k_state, k_params, k_state2 = jax.random.split(key, 3)

    # Small shapes per the module spec: batch=8, state_dim=16.
    batch, state_dim = 8, 16
    state = jax.random.normal(k_state, (batch, state_dim), jnp.float32)
    params = init_params(state_dim, k_params)

    out = jax.block_until_ready(rnd_target_forward(state, params))
    ref = reference_forward(state, params)
    assert out.shape == (batch, 1), out.shape
    # bf16 matmul operands (f32 accumulation) -> loosened tolerance vs f32 ref.
    assert jnp.allclose(out, ref, atol=5e-2, rtol=5e-2), (out, ref)

    # Second check: batch spanning multiple grid steps plus a padded tail
    # (TB floored at 512 per the perf review; here grid = 3 steps of 512).
    batch2 = 1200
    state2 = jax.random.normal(k_state2, (batch2, state_dim), jnp.float32)
    out2 = jax.block_until_ready(
        rnd_target_forward(state2, params, block_b=512))
    ref2 = reference_forward(state2, params)
    assert out2.shape == (batch2, 1), out2.shape
    assert jnp.allclose(out2, ref2, atol=5e-2, rtol=5e-2)

    print("KERNEL_OK")
</pallas_src>

<mosaic_0001>
module attributes {stable_mosaic.version = 11 : i64} {
  func.func @rnd_target_kernel(%arg0: i32, %arg1: memref<128x16xf32, #tpu.memory_space<vmem>>, %arg2: memref<64x16xf32, #tpu.memory_space<vmem>>, %arg3: memref<64x1xf32, #tpu.memory_space<vmem>>, %arg4: memref<64x64xf32, #tpu.memory_space<vmem>>, %arg5: memref<64x1xf32, #tpu.memory_space<vmem>>, %arg6: memref<64x1xf32, #tpu.memory_space<vmem>>, %arg7: memref<1x1xf32, #tpu.memory_space<smem>>, %arg8: memref<1x128xf32, #tpu.memory_space<vmem>>) attributes {dimension_semantics = [#tpu.dimension_semantics<parallel>], iteration_bounds = array<i64: 1>, scalar_prefetch = 0 : i64, scratch_operands = 0 : i64, tpu.core_type = #tpu.core_type<tc>, window_params = [{transform_indices = @transform_0, window_bounds = array<i64: 128, 16>}, {pipeline_mode = #tpu.pipeline_mode<synchronous>, transform_indices = @transform_1, window_bounds = array<i64: 64, 16>}, {pipeline_mode = #tpu.pipeline_mode<synchronous>, transform_indices = @transform_2, window_bounds = array<i64: 64, 1>}, {pipeline_mode = #tpu.pipeline_mode<synchronous>, transform_indices = @transform_3, window_bounds = array<i64: 64, 64>}, {pipeline_mode = #tpu.pipeline_mode<synchronous>, transform_indices = @transform_4, window_bounds = array<i64: 64, 1>}, {pipeline_mode = #tpu.pipeline_mode<synchronous>, transform_indices = @transform_5, window_bounds = array<i64: 64, 1>}, {transform_indices = @transform_6, window_bounds = array<i64: 1, 1>}, {transform_indices = @transform_7, window_bounds = array<i64: 1, 128>}]} {
    %c0 = arith.constant 0 : index
    %c0_0 = arith.constant 0 : index
    %0 = vector.load %arg1[%c0, %c0_0] : memref<128x16xf32, #tpu.memory_space<vmem>>, vector<128x16xf32>
    %1 = arith.truncf %0 : vector<128x16xf32> to vector<128x16xbf16>
    %c0_1 = arith.constant 0 : index
    %c0_2 = arith.constant 0 : index
    %2 = vector.load %arg2[%c0_1, %c0_2] : memref<64x16xf32, #tpu.memory_space<vmem>>, vector<64x16xf32>
    %3 = arith.truncf %2 : vector<64x16xf32> to vector<64x16xbf16>
    %cst = arith.constant dense<0.000000e+00> : vector<64x128xf32>
    %4 = tpu.matmul %3, %1, %cst {dimension_numbers = #tpu.dot_dimension_numbers<[1], [1], [0], [0], [0, 0, 1, 0], [], []>} : vector<64x16xbf16>, vector<128x16xbf16>, vector<64x128xf32> -> vector<64x128xf32>
    %c0_3 = arith.constant 0 : index
    %c0_4 = arith.constant 0 : index
    %5 = vector.load %arg3[%c0_3, %c0_4] : memref<64x1xf32, #tpu.memory_space<vmem>>, vector<64x1xf32>
    %6 = vector.broadcast %5 : vector<64x1xf32> to vector<64x128xf32>
    %7 = arith.addf %4, %6 : vector<64x128xf32>
    %cst_5 = arith.constant 0.000000e+00 : f32
    %8 = vector.broadcast %cst_5 : f32 to vector<64x128xf32>
    %9 = arith.cmpf ogt, %7, %8 : vector<64x128xf32>
    %cst_6 = arith.constant 0.000000e+00 : f32
    %10 = vector.broadcast %cst_6 : f32 to vector<64x128xf32>
    %11 = arith.minimumf %7, %10 : vector<64x128xf32>
    %12 = math.exp %11 : vector<64x128xf32>
    %cst_7 = arith.constant 1.000000e+00 : f32
    %13 = vector.broadcast %cst_7 : f32 to vector<64x128xf32>
    %14 = arith.subf %12, %13 : vector<64x128xf32>
    %15 = arith.select %9, %7, %14 : vector<64x128xi1>, vector<64x128xf32>
    %c0_8 = arith.constant 0 : index
    %c0_9 = arith.constant 0 : index
    %16 = vector.load %arg4[%c0_8, %c0_9] : memref<64x64xf32, #tpu.memory_space<vmem>>, vector<64x64xf32>
    %17 = arith.truncf %16 : vector<64x64xf32> to vector<64x64xbf16>
    %18 = arith.truncf %15 : vector<64x128xf32> to vector<64x128xbf16>
    %cst_10 = arith.constant dense<0.000000e+00> : vector<64x128xf32>
    %19 = tpu.matmul %17, %18, %cst_10 {dimension_numbers = #tpu.dot_dimension_numbers<[1], [0], [0], [1], [0, 0, 1, 1], [], []>} : vector<64x64xbf16>, vector<64x128xbf16>, vector<64x128xf32> -> vector<64x128xf32>
    %c0_11 = arith.constant 0 : index
    %c0_12 = arith.constant 0 : index
    %20 = vector.load %arg5[%c0_11, %c0_12] : memref<64x1xf32, #tpu.memory_space<vmem>>, vector<64x1xf32>
    %21 = vector.broadcast %20 : vector<64x1xf32> to vector<64x128xf32>
    %22 = arith.addf %19, %21 : vector<64x128xf32>
    %cst_13 = arith.constant 0.000000e+00 : f32
    %23 = vector.broadcast %cst_13 : f32 to vector<64x128xf32>
    %24 = arith.cmpf ogt, %22, %23 : vector<64x128xf32>
    %cst_14 = arith.constant 0.000000e+00 : f32
    %25 = vector.broadcast %cst_14 : f32 to vector<64x128xf32>
    %26 = arith.minimumf %22, %25 : vector<64x128xf32>
    %27 = math.exp %26 : vector<64x128xf32>
    %cst_15 = arith.constant 1.000000e+00 : f32
    %28 = vector.broadcast %cst_15 : f32 to vector<64x128xf32>
    %29 = arith.subf %27, %28 : vector<64x128xf32>
    %30 = arith.select %24, %22, %29 : vector<64x128xi1>, vector<64x128xf32>
    %c0_16 = arith.constant 0 : index
    %c0_17 = arith.constant 0 : index
    %31 = vector.load %arg6[%c0_16, %c0_17] : memref<64x1xf32, #tpu.memory_space<vmem>>, vector<64x1xf32>
    %32 = vector.broadcast %31 : vector<64x1xf32> to vector<64x128xf32>
    %33 = arith.mulf %30, %32 : vector<64x128xf32>
    %cst_18 = arith.constant dense<0.000000e+00> : vector<128xf32>
    %34 = vector.multi_reduction <add>, %33, %cst_18 [0] : vector<64x128xf32> to vector<128xf32>
    %35 = vector.shape_cast %34 : vector<128xf32> to vector<1x128xf32>
    %c0_19 = arith.constant 0 : index
    %c0_20 = arith.constant 0 : index
    %36 = memref.load %arg7[%c0_19, %c0_20] : memref<1x1xf32, #tpu.memory_space<smem>>
    %37 = vector.broadcast %36 : f32 to vector<1x128xf32>
    %38 = arith.addf %35, %37 : vector<1x128xf32>
    %c0_21 = arith.constant 0 : index
    %c0_22 = arith.constant 0 : index
    %39 = vector.load %arg8[%c0_21, %c0_22] : memref<1x128xf32, #tpu.memory_space<vmem>>, vector<1x128xf32>
    tpu.vector_store %arg8[%c0_21, %c0_22], %38 {strides = array<i32>} : memref<1x128xf32, #tpu.memory_space<vmem>>, vector<1x128xf32>,
    return
  }
  func.func @transform_0(%arg0: i32) -> (i32, i32) {
    %c0_i32 = arith.constant 0 : i32
    %c0_i32_0 = arith.constant 0 : i32
    return %arg0, %c0_i32 : i32, i32
  }
  func.func @transform_1(%arg0: i32) -> (i32, i32) {
    %c0_i32 = arith.constant 0 : i32
    %c0_i32_0 = arith.constant 0 : i32
    %c0_i32_1 = arith.constant 0 : i32
    return %c0_i32, %c0_i32_0 : i32, i32
  }
  func.func @transform_2(%arg0: i32) -> (i32, i32) {
    %c0_i32 = arith.constant 0 : i32
    %c0_i32_0 = arith.constant 0 : i32
    %c0_i32_1 = arith.constant 0 : i32
    return %c0_i32, %c0_i32_0 : i32, i32
  }
  func.func @transform_3(%arg0: i32) -> (i32, i32) {
    %c0_i32 = arith.constant 0 : i32
    %c0_i32_0 = arith.constant 0 : i32
    %c0_i32_1 = arith.constant 0 : i32
    return %c0_i32, %c0_i32_0 : i32, i32
  }
  func.func @transform_4(%arg0: i32) -> (i32, i32) {
    %c0_i32 = arith.constant 0 : i32
    %c0_i32_0 = arith.constant 0 : i32
    %c0_i32_1 = arith.constant 0 : i32
    return %c0_i32, %c0_i32_0 : i32, i32
  }
  func.func @transform_5(%arg0: i32) -> (i32, i32) {
    %c0_i32 = arith.constant 0 : i32
    %c0_i32_0 = arith.constant 0 : i32
    %c0_i32_1 = arith.constant 0 : i32
    return %c0_i32, %c0_i32_0 : i32, i32
  }
  func.func @transform_6(%arg0: i32) -> (i32, i32) {
    %c0_i32 = arith.constant 0 : i32
    %c0_i32_0 = arith.constant 0 : i32
    %c0_i32_1 = arith.constant 0 : i32
    return %c0_i32, %c0_i32_0 : i32, i32
  }
  func.func @transform_7(%arg0: i32) -> (i32, i32) {
    %c0_i32 = arith.constant 0 : i32
    %c0_i32_0 = arith.constant 0 : i32
    return %c0_i32, %arg0 : i32, i32
  }
}

</mosaic_0001>

<bundles_post_ra>
// kernel: tpu_custom_call.1
= control target key start
LH: loop header
LB: loop body
LE: loop exit
PB: predicated region body
PF: predicated region fallthrough
CT: control target
= control target key end

     0   :  { %vm113_vm0 = vcmask 130048   ;;  %s801_s0 = inlined_call_operand.vmem [shape: f32[128,16], index: 0, kind: input, shape index: {}]   ;;  %s802_s1 = inlined_call_operand.vmem [shape: f32[64,16], index: 1, kind: input, shape index: {}]   ;;  %s803_s2 = inlined_call_operand.vmem [shape: f32[64,1], index: 2, kind: input, shape index: {}]   ;;  %s804_s3 = inlined_call_operand.vmem [shape: f32[64,64], index: 3, kind: input, shape index: {}]   ;;  %s805_s4 = inlined_call_operand.vmem [shape: f32[64,1], index: 4, kind: input, shape index: {}]   ;;  %s806_s5 = inlined_call_operand.vmem [shape: f32[64,1], index: 5, kind: input, shape index: {}]   ;;  %s807_s6 = inlined_call_operand.<no memory space> [shape: f32[1,1], index: 6, kind: input, shape index: {}]   ;;  %s808_s7 = inlined_call_operand.hbm [shape: f32[1,128], index: 7, kind: output, shape index: {}]  }
   0x1   :  { %v43_v0 = vld [vmem:[%s801_s0 + $0x70] sm:$0xff]  ;;  %v44_v1 = vld [vmem:[%s801_s0 + $0x78] sm:$0xff]  ;;  %v41_v3 = vld [vmem:[%s801_s0 + $0x60] sm:$0xff] }
   0x2   :  { %v52_v2 = vpack.c.bf16 %v44_v1, %v43_v0  ;;  %v42_v4 = vld [vmem:[%s801_s0 + $0x68] sm:$0xff] }
   0x4   :  { %v148_v5 = vsel %vm113_vm0, %v52_v2, 0 }
   0x5   :  { %13 = vsyncpa [#allocation4], 0  ;;  %495 = vmatpush.bf16.xpose.msra.mxu3 %v148_v5  ;;  %150 = vmatpush.bf16.xpose.msra.mxu0 %v148_v5  ;;  %v51_v6 = vpack.c.bf16 %v42_v4, %v41_v3  ;;  %v71_v7 = vld [vmem:[%s803_s2 + $0x30] sm:$0xff]  ;;  %v573_v8 = vmov 0   ;;  %v40_v11 = vld [vmem:[%s801_s0 + $0x58] sm:$0xff]  ;;  %vm291_vm9 = vcmask 523264  }
   0x6   :  { %494 = vmatpush.bf16.xpose.msra.mxu2 %v148_v5  ;;  %512 = vset.pattern.permute.xlu0 %v573_v8  ;;  %v39_v10 = vld [vmem:[%s801_s0 + $0x50] sm:$0xff]  ;;  %v69_v13 = vld [vmem:[%s803_s2 + $0x20] sm:$0xff]  ;;  %v72_v14 = vld [vmem:[%s803_s2 + $0x38] sm:$0xff]  ;;  %s461_s17 = sshll.u32 %s808_s7, 4  ;;  %s462_s17 = int_to_ptr.hbm [resolvable:$true] %s461_s17 }
   0x7   :  { %513 = vset.pattern.permute.xlu1 %v573_v8  ;;  %105 = vperm.xlu0 %512, %v71_v7   ;;  %v145_v9 = vsel %vm113_vm0, %v51_v6, 0  ;;  %v50_v12 = vpack.c.bf16 %v40_v11, %v39_v10  ;;  %v37_v16 = vld [vmem:[%s801_s0 + $0x40] sm:$0xff]  ;;  %v38_v17 = vld [vmem:[%s801_s0 + $0x48] sm:$0xff]  ;;  %v35_v22 = vld [vmem:[%s801_s0 + $0x30] sm:$0xff] }
   0x8   :  { %514 = vset.pattern.permute.xlu2 %v573_v8  ;;  %95 = vperm.xlu1 %513, %v69_v13   ;;  %v49_v18 = vpack.c.bf16 %v38_v17, %v37_v16  ;;  %v70_v19 = vld [vmem:[%s803_s2 + $0x28] sm:$0xff]  ;;  %v65_v20 = vld [vmem:[%s803_s2] sm:$0xff]  ;;  %v36_v23 = vld [vmem:[%s801_s0 + $0x38] sm:$0xff] }
   0x9   :  { %v142_v15 = vsel %vm113_vm0, %v50_v12, 0  ;;  %v48_v24 = vpack.c.bf16 %v36_v23, %v35_v22  ;;  %v66_v25 = vld [vmem:[%s803_s2 + $0x8] sm:$0xff]  ;;  %v33_v27 = vld [vmem:[%s801_s0 + $0x20] sm:$0xff]  ;;  %v245_v30 = vld [vmem:[%s805_s4 + $0x10] sm:$0xff] }
   0xa   :  { %v139_v21 = vsel %vm113_vm0, %v49_v18, 0  ;;  %v34_v28 = vld [vmem:[%s801_s0 + $0x28] sm:$0xff]  ;;  %v67_v31 = vld [vmem:[%s803_s2 + $0x10] sm:$0xff]  ;;  %v32_v35 = vld [vmem:[%s801_s0 + $0x18] sm:$0xff] }
   0xb   :  { %v136_v26 = vsel %vm113_vm0, %v48_v24, 0  ;;  %v244_v29 = vld [vmem:[%s805_s4 + $0x8] sm:$0xff]  ;;  %v47_v32 = vpack.c.bf16 %v34_v28, %v33_v27  ;;  %85 = vperm.xlu2 %514, %v67_v31   ;;  %v31_v34 = vld [vmem:[%s801_s0 + $0x10] sm:$0xff]  ;;  %v247_v36 = vld [vmem:[%s805_s4 + $0x20] sm:$0xff] }
   0xc   :  { %v248_v37 = vld [vmem:[%s805_s4 + $0x28] sm:$0xff]  ;;  %v46_v38 = vpack.c.bf16 %v32_v35, %v31_v34  ;;  %v29_v40 = vld [vmem:[%s801_s0] sm:$0xff]  ;;  %v68_v42 = vld [vmem:[%s803_s2 + $0x18] sm:$0xff] }
   0xd   :  { %497 = vmatpush.bf16.xpose.msra.mxu3 %v145_v9  ;;  %151 = vmatpush.bf16.xpose.msra.mxu0 %v145_v9  ;;  %v133_v33 = vsel %vm113_vm0, %v47_v32, 0  ;;  %v30_v41 = vld [vmem:[%s801_s0 + $0x8] sm:$0xff]  ;;  %v250_v43 = vld [vmem:[%s805_s4 + $0x38] sm:$0xff]  ;;  %v381_v44 = vld [vmem:[%s806_s5] sm:$0xff]  ;;  %s574_s0 = smov [#allocation3]  }
   0xe   :  { %496 = vmatpush.bf16.xpose.msra.mxu2 %v145_v9  ;;  %v130_v39 = vsel %vm113_vm0, %v46_v38, 0  ;;  %v45_v45 = vpack.c.bf16 %v30_v41, %v29_v40  ;;  %v243_v47 = vld [vmem:[%s805_s4] sm:$0xff]  ;;  %v383_v49 = vld [vmem:[%s806_s5 + $0x10] sm:$0xff]  ;;  %v384_v50 = vld [vmem:[%s806_s5 + $0x18] sm:$0xff]  ;;  %s459_s15 = sshll.u32 %s574_s0, 4  ;;  %s460_s15 = int_to_ptr.vmem [resolvable:$true] %s459_s15 }
   0xf   :  { %110 = vperm.xlu0 %512, %v72_v14   ;;  %v57_v48 = vld [vmem:[%s802_s1 + $0x20] sm:$0xff]  ;;  %v58_v51 = vld [vmem:[%s802_s1 + $0x28] sm:$0xff]  ;;  %v55_v54 = vld [vmem:[%s802_s1 + $0x10] sm:$0xff] }
  0x10   :  { %100 = vperm.xlu1 %513, %v70_v19   ;;  %v127_v46 = vsel %vm113_vm0, %v45_v45, 0  ;;  %v53_v52 = vld [vmem:[%s802_s1] sm:$0xff]  ;;  %v54_v53 = vld [vmem:[%s802_s1 + $0x8] sm:$0xff]  ;;  %v56_v55 = vld [vmem:[%s802_s1 + $0x18] sm:$0xff]  ;;  %v63_v56 = vpack.c.bf16 %v58_v51, %v57_v48 }
  0x11   :  { %v61_v57 = vpack.c.bf16 %v54_v53, %v53_v52  ;;  %v62_v58 = vpack.c.bf16 %v56_v55, %v55_v54  ;;  %v246_v59 = vld [vmem:[%s805_s4 + $0x18] sm:$0xff]  ;;  %v386_v60 = vld [vmem:[%s806_s5 + $0x28] sm:$0xff]  ;;  %v387_v61 = vld [vmem:[%s806_s5 + $0x30] sm:$0xff] }
  0x12   :  { %v249_v62 = vld [vmem:[%s805_s4 + $0x30] sm:$0xff]  ;;  %v60_v0 = vld [vmem:[%s802_s1 + $0x38] sm:$0xff]  ;;  %v382_v2 = vld [vmem:[%s806_s5 + $0x8] sm:$0xff] }
  0x13   :  { %90 = vperm.xlu2 %514, %v68_v42   ;;  %v59_v63 = vld [vmem:[%s802_s1 + $0x30] sm:$0xff]  ;;  %v385_v3 = vld [vmem:[%s806_s5 + $0x20] sm:$0xff]  ;;  %v388_v4 = vld [vmem:[%s806_s5 + $0x38] sm:$0xff] }
  0x14   :  { %v64_v1 = vpack.c.bf16 %v60_v0, %v59_v63 }
  0x15   :  { %499 = vmatpush.bf16.xpose.msra.mxu3 %v142_v15  ;;  %152 = vmatpush.bf16.xpose.msra.mxu0 %v142_v15 }
  0x16   :  { %498 = vmatpush.bf16.xpose.msra.mxu2 %v142_v15 }
  0x17   :  { %75 = vperm.xlu0 %512, %v65_v20  }
  0x18   :  { %80 = vperm.xlu1 %513, %v66_v25  }
  0x1b   :  { %253 = vperm.xlu2 %514, %v243_v47  }
  0x1d   :  { %501 = vmatpush.bf16.xpose.msra.mxu3 %v139_v21  ;;  %153 = vmatpush.bf16.xpose.msra.mxu0 %v139_v21 }
  0x1e   :  { %500 = vmatpush.bf16.xpose.msra.mxu2 %v139_v21 }
  0x1f   :  { %258 = vperm.xlu0 %512, %v244_v29  }
  0x20   :  { %263 = vperm.xlu1 %513, %v245_v30  }
  0x23   :  { %268 = vperm.xlu2 %514, %v246_v59  }
  0x25   :  { %503 = vmatpush.bf16.xpose.msra.mxu3 %v136_v26  ;;  %154 = vmatpush.bf16.xpose.msra.mxu0 %v136_v26 }
  0x26   :  { %502 = vmatpush.bf16.xpose.msra.mxu2 %v136_v26 }
  0x27   :  { %273 = vperm.xlu0 %512, %v247_v36  }
  0x28   :  { %278 = vperm.xlu1 %513, %v248_v37  }
  0x2b   :  { %283 = vperm.xlu2 %514, %v249_v62  }
  0x2d   :  { %505 = vmatpush.bf16.xpose.msra.mxu3 %v133_v33  ;;  %155 = vmatpush.bf16.xpose.msra.mxu0 %v133_v33 }
  0x2e   :  { %504 = vmatpush.bf16.xpose.msra.mxu2 %v133_v33 }
  0x2f   :  { %288 = vperm.xlu0 %512, %v250_v43  }
  0x30   :  { %391 = vperm.xlu1 %513, %v381_v44  }
  0x33   :  { %396 = vperm.xlu2 %514, %v382_v2  }
  0x35   :  { %507 = vmatpush.bf16.xpose.msra.mxu3 %v130_v39  ;;  %156 = vmatpush.bf16.xpose.msra.mxu0 %v130_v39 }
  0x36   :  { %506 = vmatpush.bf16.xpose.msra.mxu2 %v130_v39 }
  0x37   :  { %401 = vperm.xlu0 %512, %v383_v49  }
  0x38   :  { %406 = vperm.xlu1 %513, %v384_v50  }
  0x3b   :  { %411 = vperm.xlu2 %514, %v385_v3  }
  0x3d   :  { %509 = vmatpush.bf16.xpose.msra.mxu3 %v127_v46  ;;  %157 = vmatpush.bf16.xpose.msra.mxu0 %v127_v46 }
  0x3e   :  { %508 = vmatpush.bf16.xpose.msra.mxu2 %v127_v46 }
  0x3f   :  { %416 = vperm.xlu0 %512, %v386_v60  }
  0x40   :  { %421 = vperm.xlu1 %513, %v387_v61  }
  0x43   :  { %426 = vperm.xlu2 %514, %v388_v4  }
  0x44   :  { %472 = vmatmul.msk.bf16.vlgmr.msra.gmra.mxu3 %vm113_vm0, %v63_v56  ;;  %470 = vmatmul.msk.bf16.vlgmr.msra.gmra.mxu0 %vm113_vm0, %v61_v57 }
  0x45   :  { %471 = vmatmul.msk.bf16.vlgmr.msra.gmra.mxu2 %vm113_vm0, %v62_v58 }
  0x54   :  { %473 = vmatmul.msk.bf16.gmra.mxu3 %vm113_vm0, %v64_v1 }
  0x65   :  { %v86_v10 = vpop.permute.xlu2 %85 }
  0x6d   :  { %v91_v20 = vpop.permute.xlu2 %90 }
  0x79   :  { %v106_v6 = vpop.permute.xlu0 %105 }
  0x7a   :  { %v96_v7 = vpop.permute.xlu1 %95 }
  0x81   :  { %v111_v12 = vpop.permute.xlu0 %110 }
  0x82   :  { %v101_v13 = vpop.permute.xlu1 %100 }
  0x89   :  { %v76_v26 = vpop.permute.xlu0 %75 }
  0x8a   :  { %v81_v28 = vpop.permute.xlu1 %80 }
  0xc1   :  { %v159_v11 = vpop.f32.mrf.mxu0 }
  0xc2   :  { %v160_v29 = vadd.f32 %v159_v11, %v76_v26  ;;  %v259_v26 = vpop.permute.xlu0 %258 }
  0xc4   :  { %v187_v38 = vmin.f32 %v160_v29, 0.0  ;;  %vm179_vm7 = vcmp.gt.f32.partialorder %v160_v29, 0.0 }
  0xc6   :  { %v195_v43 = vmul.f32 1.442695, %v187_v38 }
  0xc7   :  { %v169_v5 = vpop.f32.mrf.mxu3 }
  0xc8   :  { %v164_v8 = vpop.f32.mrf.mxu2  ;;  %v170_v17 = vadd.f32 %v169_v5, %v96_v7 }
  0xc9   :  { %v165_v21 = vadd.f32 %v164_v8, %v86_v10  ;;  %v161_v25 = vpop.f32.mrf.mxu0  ;;  %v227_v8 = vld [vmem:[%s804_s3] sm:$0xff] }
  0xca   :  { %v191_v24 = vmin.f32 %v170_v17, 0.0  ;;  %v162_v32 = vadd.f32 %v161_v25, %v81_v28  ;;  %vm183_vm4 = vcmp.gt.f32.partialorder %v170_v17, 0.0 }
  0xcb   :  { %v189_v30 = vmin.f32 %v165_v21, 0.0  ;;  %vm181_vm5 = vcmp.gt.f32.partialorder %v165_v21, 0.0 }
  0xcc   :  { %v203_v36 = vmul.f32 1.442695, %v191_v24  ;;  %v188_v40 = vmin.f32 %v162_v32, 0.0  ;;  %vm180_vm8 = vcmp.gt.f32.partialorder %v162_v32, 0.0  ;;  %v254_v24 = vpop.permute.xlu2 %253 }
  0xcd   :  { %v199_v39 = vmul.f32 1.442695, %v189_v30 }
  0xce   :  { %v197_v45 = vmul.f32 1.442695, %v188_v40 }
  0xcf   :  { %v171_v9 = vpop.f32.mrf.mxu3 }
  0xd0   :  { %v172_v15 = vadd.f32 %v171_v9, %v101_v13  ;;  %v166_v18 = vpop.f32.mrf.mxu2  ;;  %v228_v9 = vld [vmem:[%s804_s3 + $0x8] sm:$0xff]  ;;  %v230_v13 = vld [vmem:[%s804_s3 + $0x18] sm:$0xff] }
  0xd1   :  { %v167_v23 = vadd.f32 %v166_v18, %v91_v20  ;;  %v235_v11 = vpack.c.bf16 %v228_v9, %v227_v8  ;;  %v233_v18 = vld [vmem:[%s804_s3 + $0x30] sm:$0xff] }
  0xd2   :  { %v192_v22 = vmin.f32 %v172_v15, 0.0  ;;  %vm184_vm3 = vcmp.gt.f32.partialorder %v172_v15, 0.0 }
  0xd3   :  { %v190_v34 = vmin.f32 %v167_v23, 0.0  ;;  %vm182_vm6 = vcmp.gt.f32.partialorder %v167_v23, 0.0 }
  0xd4   :  { %v205_v33 = vmul.f32 1.442695, %v192_v22 }
  0xd5   :  { %v201_v41 = vmul.f32 1.442695, %v190_v34 }
  0xd7   :  { %v174_v14 = vpop.f32.mrf.mxu3 }
  0xd8   :  { %v175_v16 = vadd.f32 %v174_v14, %v106_v6 }
  0xda   :  { %v193_v19 = vmin.f32 %v175_v16, 0.0  ;;  %vm185_vm1 = vcmp.gt.f32.partialorder %v175_v16, 0.0 }
  0xdc   :  { %v207_v27 = vmul.f32 1.442695, %v193_v19  ;;  %v234_v19 = vld [vmem:[%s804_s3 + $0x38] sm:$0xff] }
  0xdd   :  { %v238_v20 = vpack.c.bf16 %v234_v19, %v233_v18 }
  0xde   :  { %515 = vpow2.f32 %v207_v27  ;;  %v264_v27 = vpop.permute.xlu1 %263 }
  0xdf   :  { %v176_v31 = vpop.f32.mrf.mxu3  ;;  %517 = vpow2.f32 %v205_v33 }
  0xe0   :  { %v177_v35 = vadd.f32 %v176_v31, %v111_v12  ;;  %519 = vpow2.f32 %v203_v36  ;;  %v229_v12 = vld [vmem:[%s804_s3 + $0x10] sm:$0xff] }
  0xe1   :  { %v236_v14 = vpack.c.bf16 %v230_v13, %v229_v12 }
  0xe2   :  { %v194_v37 = vmin.f32 %v177_v35, 0.0  ;;  %vm186_vm2 = vcmp.gt.f32.partialorder %v177_v35, 0.0 }
  0xe4   :  { %v209_v42 = vmul.f32 1.442695, %v194_v37  ;;  %v516_v44 = vpop.eup %515 }
  0xe5   :  { %v518_v46 = vpop.eup %517  ;;  %v480_v48 = vadd.f32 -1.0, %v516_v44 }
  0xe6   :  { %521 = vpow2.f32 %v209_v42  ;;  %v520_v47 = vpop.eup %519  ;;  %v479_v52 = vadd.f32 -1.0, %v518_v46 }
  0xe7   :  { %523 = vpow2.f32 %v199_v39  ;;  %v225_v54 = vsel %vm185_vm1, %v175_v16, %v480_v48  ;;  %v478_v56 = vadd.f32 -1.0, %v520_v47  ;;  %v232_v16 = vld [vmem:[%s804_s3 + $0x28] sm:$0xff]  ;;  %v279_v39 = vpop.permute.xlu1 %278 }
  0xe8   :  { %525 = vpow2.f32 %v201_v41  ;;  %v224_v59 = vsel %vm184_vm3, %v172_v15, %v479_v52  ;;  %v231_v15 = vld [vmem:[%s804_s3 + $0x20] sm:$0xff] }
  0xe9   :  { %527 = vpow2.f32 %v195_v43  ;;  %v223_v63 = vsel %vm183_vm4, %v170_v17, %v478_v56  ;;  %v237_v17 = vpack.c.bf16 %v232_v16, %v231_v15 }
  0xea   :  { %529 = vpow2.f32 %v197_v45  ;;  %v241_v0 = vpack.c.bf16 %v224_v59, %v223_v63 }
  0xec   :  { %v522_v49 = vpop.eup %521 }
  0xed   :  { %v524_v50 = vpop.eup %523  ;;  %v481_v51 = vadd.f32 -1.0, %v522_v49 }
  0xee   :  { %v526_v53 = vpop.eup %525  ;;  %v476_v60 = vadd.f32 -1.0, %v524_v50 }
  0xef   :  { %v226_v55 = vsel %vm186_vm2, %v177_v35, %v481_v51  ;;  %v528_v58 = vpop.eup %527  ;;  %v477_v61 = vadd.f32 -1.0, %v526_v53  ;;  %v274_v35 = vpop.permute.xlu0 %273 }
  0xf0   :  { %v242_v57 = vpack.c.bf16 %v226_v55, %v225_v54  ;;  %v530_v62 = vpop.eup %529  ;;  %v221_v1 = vsel %vm181_vm5, %v165_v21, %v476_v60  ;;  %v474_v3 = vadd.f32 -1.0, %v528_v58  ;;  %v392_v53 = vpop.permute.xlu1 %391 }
  0xf1   :  { %v222_v2 = vsel %vm182_vm6, %v167_v23, %v477_v61  ;;  %v475_v4 = vadd.f32 -1.0, %v530_v62 }
  0xf2   :  { %308 = vmatpush.bf16.msra.mxu1 %v242_v57  ;;  %v240_v5 = vpack.c.bf16 %v222_v2, %v221_v1  ;;  %v219_v6 = vsel %vm179_vm7, %v160_v29, %v474_v3  ;;  %v269_v29 = vpop.permute.xlu2 %268 }
  0xf3   :  { %v220_v7 = vsel %vm180_vm8, %v162_v32, %v475_v4 }
  0xf4   :  { %v239_v10 = vpack.c.bf16 %v220_v7, %v219_v6 }
  0xf6   :  { %309 = vmatpush.bf16.msra.mxu1 %v241_v0 }
  0xf7   :  { %v289_v51 = vpop.permute.xlu0 %288 }
  0xf8   :  { %v407_v9 = vpop.permute.xlu1 %406 }
  0xfa   :  { %310 = vmatpush.bf16.msra.mxu1 %v240_v5  ;;  %v284_v47 = vpop.permute.xlu2 %283 }
  0xfe   :  { %311 = vmatpush.bf16.msra.mxu1 %v239_v10 }
  0xff   :  { %v402_v3 = vpop.permute.xlu0 %401 }
 0x101   :  { %482 = vmatmul.msk.bf16.vlgmr.msra.gmra.mxu1 %vm291_vm9, %v235_v11 }
 0x102   :  { %v397_v60 = vpop.permute.xlu2 %396 }
 0x111   :  { %483 = vmatmul.msk.bf16.gmra.mxu1 %vm291_vm9, %v236_v14 }
 0x121   :  { %484 = vmatmul.msk.bf16.gmra.mxu1 %vm291_vm9, %v237_v17 }
 0x131   :  { %485 = vmatmul.msk.bf16.gmra.mxu1 %vm291_vm9, %v238_v20 }
 0x17e   :  { %v313_v21 = vpop.f32.mrf.mxu1 }
 0x17f   :  { %v314_v30 = vadd.f32 %v313_v21, %v254_v24  ;;  %v412_v21 = vpop.permute.xlu2 %411 }
 0x181   :  { %v341_v36 = vmin.f32 %v314_v30, 0.0  ;;  %vm333_vm11 = vcmp.gt.f32.partialorder %v314_v30, 0.0 }
 0x183   :  { %v349_v42 = vmul.f32 1.442695, %v341_v36 }
 0x186   :  { %v315_v22 = vpop.f32.mrf.mxu1 }
 0x187   :  { %v316_v28 = vadd.f32 %v315_v22, %v259_v26 }
 0x189   :  { %v342_v33 = vmin.f32 %v316_v28, 0.0  ;;  %vm334_vm10 = vcmp.gt.f32.partialorder %v316_v28, 0.0 }
 0x18b   :  { %v351_v40 = vmul.f32 1.442695, %v342_v33  ;;  %v422_v33 = vpop.permute.xlu1 %421 }
 0x18d   :  { %531 = vpow2.f32 %v351_v40 }
 0x18e   :  { %v318_v23 = vpop.f32.mrf.mxu1  ;;  %533 = vpow2.f32 %v349_v42 }
 0x18f   :  { %v319_v32 = vadd.f32 %v318_v23, %v264_v27 }
 0x191   :  { %v343_v37 = vmin.f32 %v319_v32, 0.0  ;;  %vm335_vm12 = vcmp.gt.f32.partialorder %v319_v32, 0.0 }
 0x193   :  { %v353_v44 = vmul.f32 1.442695, %v343_v37  ;;  %v532_v55 = vpop.eup %531 }
 0x194   :  { %v534_v57 = vpop.eup %533  ;;  %v487_v61 = vadd.f32 -1.0, %v532_v55 }
 0x195   :  { %535 = vpow2.f32 %v353_v44  ;;  %v486_v0 = vadd.f32 -1.0, %v534_v57 }
 0x196   :  { %v320_v25 = vpop.f32.mrf.mxu1  ;;  %v374_v4 = vsel %vm334_vm10, %v316_v28, %v487_v61 }
 0x197   :  { %v321_v34 = vadd.f32 %v320_v25, %v269_v29  ;;  %v373_v10 = vsel %vm333_vm11, %v314_v30, %v486_v0  ;;  %v430_v13 = vmul.f32 %v397_v60, %v374_v4  ;;  %v417_v29 = vpop.permute.xlu0 %416 }
 0x198   :  { %v429_v18 = vmul.f32 %v392_v53, %v373_v10 }
 0x199   :  { %v344_v41 = vmin.f32 %v321_v34, 0.0  ;;  %vm336_vm13 = vcmp.gt.f32.partialorder %v321_v34, 0.0 }
 0x19a   :  { %v437_v24 = vadd.f32 %v430_v13, %v429_v18 }
 0x19b   :  { %v355_v48 = vmul.f32 1.442695, %v344_v41  ;;  %v536_v58 = vpop.eup %535 }
 0x19c   :  { %v488_v1 = vadd.f32 -1.0, %v536_v58 }
 0x19d   :  { %537 = vpow2.f32 %v355_v48 }
 0x19e   :  { %v323_v31 = vpop.f32.mrf.mxu1  ;;  %v375_v11 = vsel %vm335_vm12, %v319_v32, %v488_v1 }
 0x19f   :  { %v324_v38 = vadd.f32 %v323_v31, %v274_v35  ;;  %v431_v19 = vmul.f32 %v402_v3, %v375_v11 }
 0x1a1   :  { %v345_v45 = vmin.f32 %v324_v38, 0.0  ;;  %vm337_vm14 = vcmp.gt.f32.partialorder %v324_v38, 0.0  ;;  %v438_v27 = vadd.f32 %v437_v24, %v431_v19 }
 0x1a3   :  { %v357_v50 = vmul.f32 1.442695, %v345_v45  ;;  %v538_v62 = vpop.eup %537 }
 0x1a4   :  { %v489_v5 = vadd.f32 -1.0, %v538_v62 }
 0x1a5   :  { %539 = vpow2.f32 %v357_v50 }
 0x1a6   :  { %v325_v43 = vpop.f32.mrf.mxu1  ;;  %v376_v15 = vsel %vm336_vm13, %v321_v34, %v489_v5 }
 0x1a7   :  { %v326_v46 = vadd.f32 %v325_v43, %v279_v39  ;;  %v432_v25 = vmul.f32 %v407_v9, %v376_v15 }
 0x1a9   :  { %v346_v49 = vmin.f32 %v326_v46, 0.0  ;;  %vm338_vm15 = vcmp.gt.f32.partialorder %v326_v46, 0.0  ;;  %v439_v31 = vadd.f32 %v438_v27, %v432_v25 }
 0x1ab   :  { %v359_v52 = vmul.f32 1.442695, %v346_v49  ;;  %v540_v2 = vpop.eup %539  ;;  %v451_v49 = vstv %s807_s6 }
 0x1ac   :  { %v490_v12 = vadd.f32 -1.0, %v540_v2 }
 0x1ad   :  { %541 = vpow2.f32 %v359_v52 }
 0x1ae   :  { %v328_v54 = vpop.f32.mrf.mxu1  ;;  %v377_v22 = vsel %vm337_vm14, %v324_v38, %v490_v12  ;;  %v427_v38 = vpop.permute.xlu2 %426 }
 0x1af   :  { %v329_v56 = vadd.f32 %v328_v54, %v284_v47  ;;  %v433_v28 = vmul.f32 %v412_v21, %v377_v22 }
 0x1b1   :  { %v347_v59 = vmin.f32 %v329_v56, 0.0  ;;  %vm339_vm0 = vcmp.gt.f32.partialorder %v329_v56, 0.0  ;;  %v440_v35 = vadd.f32 %v439_v31, %v433_v28 }
 0x1b3   :  { %v361_v63 = vmul.f32 1.442695, %v347_v59  ;;  %v542_v7 = vpop.eup %541 }
 0x1b4   :  { %v491_v16 = vadd.f32 -1.0, %v542_v7 }
 0x1b5   :  { %543 = vpow2.f32 %v361_v63 }
 0x1b6   :  { %v330_v6 = vpop.f32.mrf.mxu1  ;;  %v378_v26 = vsel %vm338_vm15, %v326_v46, %v491_v16 }
 0x1b7   :  { %v331_v8 = vadd.f32 %v330_v6, %v289_v51  ;;  %v434_v32 = vmul.f32 %v417_v29, %v378_v26 }
 0x1b9   :  { %v348_v14 = vmin.f32 %v331_v8, 0.0  ;;  %v441_v39 = vadd.f32 %v440_v35, %v434_v32  ;;  %vm340_vm1 = vcmp.gt.f32.partialorder %v331_v8, 0.0 }
 0x1bb   :  { %v544_v17 = vpop.eup %543  ;;  %v363_v20 = vmul.f32 1.442695, %v348_v14 }
 0x1bc   :  { %v492_v23 = vadd.f32 -1.0, %v544_v17 }
 0x1bd   :  { %545 = vpow2.f32 %v363_v20 }
 0x1be   :  { %v379_v30 = vsel %vm339_vm0, %v329_v56, %v492_v23 }
 0x1bf   :  { %v435_v36 = vmul.f32 %v422_v33, %v379_v30 }
 0x1c1   :  { %v442_v41 = vadd.f32 %v441_v39, %v435_v36 }
 0x1c3   :  { %v546_v34 = vpop.eup %545 }
 0x1c4   :  { %v493_v37 = vadd.f32 -1.0, %v546_v34 }
 0x1c6   :  { %v380_v40 = vsel %vm340_vm1, %v331_v8, %v493_v37 }
 0x1c7   :  { %v436_v42 = vmul.f32 %v427_v38, %v380_v40 }
 0x1c9   :  { %v443_v43 = vadd.f32 %v442_v41, %v436_v42 }
 0x1cb   :  { %v444_v44 = vrot.slane %v443_v43, 4 }
 0x1cd   :  { %v445_v45 = vadd.f32 %v444_v44, %v443_v43 }
 0x1cf   :  { %v446_v46 = vrot.slane %v445_v45, 2 }
 0x1d1   :  { %v447_v47 = vadd.f32 %v446_v46, %v445_v45 }
 0x1d3   :  { %v448_v48 = vrot.slane %v447_v47, 1 }
 0x1d5   :  { %v449_v50 = vadd.f32 %v448_v48, %v447_v47 }
 0x1d7   :  { %v452_v51 = vadd.f32 %v451_v49, %v449_v50 }
 0x1d9   :  { %453 = vst [vmem:[#allocation3] sm:$0x1] %v452_v51 }
 0x1da   :  { %464 = dma.vmem_to_hbm [thread:$0]  %s460_s15, 16, %s462_s17, [#allocation4]  }
 0x1db   :  { %571 = dma.done.wait [#allocation4], 16  }
 0x1dc   :  { %572 = vsyncadd [#allocation4], 4294967280 }
 0x1dd   :  { %469 = vsyncpa [#allocation4], 1 }

</bundles_post_ra>
